<compile_context>
chip_gen: v7x
topology: tpu7x:2x2x1
jax: 0.10.0
libtpu: 0.0.40
codegen_flags: <defaults>
</compile_context>

<pallas_src>
import math
import functools

import jax
import jax.numpy as jnp
from jax.experimental import pallas as pl
from jax.experimental.pallas import tpu as pltpu


def _round_up(x, m):
    return ((x + m - 1) // m) * m


def _pad_cast(x, shape, dtype):
    """Cast to dtype and zero-pad to `shape`; no-op / single fused pass when possible."""
    shape = tuple(shape)
    dtype = jnp.dtype(dtype)
    if x.shape == shape and x.dtype == dtype:
        return x
    if x.shape == shape:
        return x.astype(dtype)
    return (jnp.zeros(shape, dtype)
            .at[tuple(slice(0, s) for s in x.shape)]
            .set(x.astype(dtype)))


# --------------- kernels: tiled matmul with resident f32 accumulator ---------------

def _mm_kernel(a_ref, b_ref, o_ref, acc_ref):
    k = pl.program_id(1)
    prod = jnp.dot(a_ref[...], b_ref[...], preferred_element_type=jnp.float32)

    @pl.when(k == 0)
    def _init():
        acc_ref[...] = prod            # direct write: no separate zero-fill pass

    @pl.when(k != 0)
    def _accum():
        acc_ref[...] += prod

    @pl.when(k == pl.num_programs(1) - 1)
    def _finalize():
        o_ref[...] = acc_ref[...].astype(o_ref.dtype)


def _mm_bias_kernel(a_ref, b_ref, bias_ref, o_ref, acc_ref):
    k = pl.program_id(1)
    prod = jnp.dot(a_ref[...], b_ref[...], preferred_element_type=jnp.float32)

    @pl.when(k == 0)
    def _init():
        acc_ref[...] = prod

    @pl.when(k != 0)
    def _accum():
        acc_ref[...] += prod

    @pl.when(k == pl.num_programs(1) - 1)
    def _finalize():
        # Bias added exactly once, in f32, at finalize.
        o_ref[...] = (acc_ref[...] + bias_ref[...].astype(jnp.float32)).astype(o_ref.dtype)


def _tiled_matmul(a, b, *, tm, tk, out_dtype, bias=None):
    """C = A @ B (+ bias).  A:(M,K), B:(K,N); requires M % tm == 0, K % tk == 0.

    grid = (M//tm row tiles ["parallel" -> megacore sharding],
            K//tk contraction tiles ["arbitrary" -> resident f32 accumulator]).
    The full N columns of B live in each block (lane-dense output stores).
    """
    M, K = a.shape
    Kb, Ncols = b.shape
    assert K == Kb and M % tm == 0 and K % tk == 0

    in_specs = [
        pl.BlockSpec((tm, tk), lambda i, k: (i, k)),      # A tile, streamed over (i, k)
        pl.BlockSpec((tk, Ncols), lambda i, k: (k, 0)),   # B strip, per k
    ]
    operands = [a, b]
    kernel = _mm_kernel
    if bias is not None:
        in_specs.append(pl.BlockSpec((1, Ncols), lambda i, k: (0, 0)))
        operands.append(bias)
        kernel = _mm_bias_kernel

    cost = pl.CostEstimate(
        flops=2 * M * K * Ncols,
        transcendentals=0,
        bytes_accessed=(a.dtype.itemsize * M * K                      # A read once
                        + b.dtype.itemsize * K * Ncols * (M // tm)    # B re-read per row tile
                        + jnp.dtype(out_dtype).itemsize * M * Ncols), # C written once
    )

    return pl.pallas_call(
        kernel,
        out_shape=jax.ShapeDtypeStruct((M, Ncols), out_dtype),
        grid_spec=pltpu.PrefetchScalarGridSpec(
            num_scalar_prefetch=0,
            grid=(M // tm, K // tk),
            in_specs=in_specs,
            out_specs=pl.BlockSpec((tm, Ncols), lambda i, k: (i, 0)),
            scratch_shapes=[pltpu.VMEM((tm, Ncols), jnp.float32)],
        ),
        compiler_params=pltpu.CompilerParams(
            dimension_semantics=("parallel", "arbitrary"),
            vmem_limit_bytes=48 * 1024 * 1024,   # above defaults, under v7x 64 MiB physical
        ),
        cost_estimate=cost,
    )(*operands)


# ----------------------------------- GCN forward -----------------------------------

@functools.partial(jax.jit, static_argnames=("compute_dtype",))
def graph_convolution(inputs, adj, weight, bias=None, *, compute_dtype="bfloat16"):
    """Pallas GCN layer: adj @ (inputs @ weight) [+ bias].

    inputs: [N, F_in], adj: [N, N] (dense normalized adjacency),
    weight: [F_in, F_out], bias: optional [F_out].
    compute_dtype: operand dtype for the matmuls (default bf16; accumulation is
                   always f32).  Use None for full-f32 operands.
    Returns [N, F_out] in inputs.dtype.
    """
    N, F_in = inputs.shape
    F_out = weight.shape[1]
    out_dtype = inputs.dtype
    mm_dtype = jnp.dtype(compute_dtype) if compute_dtype is not None else jnp.dtype(inputs.dtype)

    # ---- tile selection: MXU / (8,128) aligned ----
    # Row tile of adj/output: as large as useful to cut support re-reads, but keep
    # >= 2 row tiles whenever N allows so the "parallel" axis feeds both v7x TCs.
    if N <= 256:
        TM = 128
    elif N <= 1024:
        TM = 256
    else:
        TM = 512
    # Node-contraction tile of the adj matmul (also support's row tile).
    TK = 512 if N >= 512 else (256 if N >= 256 else 128)
    # F_in-contraction tile of the support matmul (F_in_p is a multiple of 128).
    F_in_p = _round_up(F_in, 128)
    TKF = 512 if F_in_p % 512 == 0 else (256 if F_in_p % 256 == 0 else 128)

    N_rows = _round_up(N, TM)       # padded output rows (adj rows)
    N_cols = _round_up(N, TK)       # padded contraction extent (adj cols / support rows)
    F_out_p = _round_up(F_out, 128)

    # Cast + pad fused into one pass; skipped entirely when already conformant.
    # Zero padding guarantees padded rows/lanes contribute exactly 0.
    x_p = _pad_cast(inputs, (N_cols, F_in_p), mm_dtype)
    w_p = _pad_cast(weight, (F_in_p, F_out_p), mm_dtype)
    adj_p = _pad_cast(adj, (N_rows, N_cols), mm_dtype)

    # Stage 1: support = X @ W, computed exactly once (not per adj row tile).
    # Kept in mm_dtype so stage 2 streams half the bytes when bf16.
    support = _tiled_matmul(x_p, w_p, tm=TK, tk=TKF, out_dtype=mm_dtype)

    # Stage 2: out = adj @ support (+ bias) — the HBM-bandwidth-bound matmul.
    b_p = None
    if bias is not None:
        b_p = _pad_cast(bias.reshape(1, F_out), (1, F_out_p), jnp.float32)
    out_p = _tiled_matmul(adj_p, support, tm=TM, tk=TK, out_dtype=out_dtype, bias=b_p)

    return out_p[:N, :F_out]


def init_gcn_params(key, in_features, out_features, use_bias=False):
    """Matches reset_parameters(): uniform(-stdv, stdv), stdv = 1/sqrt(out_features)."""
    stdv = 1.0 / math.sqrt(out_features)
    kw, kb = jax.random.split(key)
    weight = jax.random.uniform(
        kw, (in_features, out_features), jnp.float32, minval=-stdv, maxval=stdv
    )
    bias = None
    if use_bias:
        bias = jax.random.uniform(
            kb, (out_features,), jnp.float32, minval=-stdv, maxval=stdv
        )
    return weight, bias


if __name__ == "__main__":
    key = jax.random.PRNGKey(0)
    k_x, k_adj, k_params = jax.random.split(key, 3)

    # Small GCN-sized problem that still exercises multi-tile grids after padding:
    # 200 nodes, 48 input features, 96 output features.
    N, F_in, F_out = 200, 48, 96

    x = jax.random.normal(k_x, (N, F_in), jnp.float32)

    # Symmetric-normalized adjacency with self-loops (deterministic).
    a = (jax.random.uniform(k_adj, (N, N)) > 0.9).astype(jnp.float32)
    a = jnp.maximum(a, a.T)
    a = a + jnp.eye(N, dtype=jnp.float32)
    deg = jnp.sum(a, axis=1)
    d_inv_sqrt = 1.0 / jnp.sqrt(deg)
    adj = a * d_inv_sqrt[:, None] * d_inv_sqrt[None, :]

    weight, _ = init_gcn_params(k_params, F_in, F_out, use_bias=False)
    weight_b, bias_b = init_gcn_params(k_params, F_in, F_out, use_bias=True)

    ref = adj @ (x @ weight)
    ref_b = adj @ (x @ weight_b) + bias_b

    # --- f32-operand path, bias=False (module default) ---
    out = jax.block_until_ready(graph_convolution(x, adj, weight, compute_dtype=None))
    assert out.shape == (N, F_out)
    assert jnp.allclose(out, ref, atol=2e-3, rtol=2e-3), "f32 no-bias mismatch"

    # --- f32-operand path, bias=True ---
    out_b = jax.block_until_ready(
        graph_convolution(x, adj, weight_b, bias_b, compute_dtype=None))
    assert jnp.allclose(out_b, ref_b, atol=2e-3, rtol=2e-3), "f32 bias mismatch"

    # --- default bf16-operand path (f32 accumulation), looser tolerance ---
    out_bf16 = jax.block_until_ready(graph_convolution(x, adj, weight_b, bias_b))
    assert jnp.allclose(out_bf16, ref_b, atol=5e-2, rtol=5e-2), "bf16 mismatch"

    print("KERNEL_OK")
</pallas_src>

<mosaic_0001>
module attributes {stable_mosaic.version = 11 : i64} {
  func.func @_mm_kernel(%arg0: i32, %arg1: i32, %arg2: memref<128x128xf32, #tpu.memory_space<vmem>>, %arg3: memref<128x128xf32, #tpu.memory_space<vmem>>, %arg4: memref<128x128xf32, #tpu.memory_space<vmem>>, %arg5: memref<128x128xf32, #tpu.memory_space<vmem>>) attributes {dimension_semantics = [#tpu.dimension_semantics<parallel>, #tpu.dimension_semantics<arbitrary>], iteration_bounds = array<i64: 2, 1>, scalar_prefetch = 0 : i64, scratch_operands = 1 : i64, tpu.core_type = #tpu.core_type<tc>, window_params = [{transform_indices = @transform_0, window_bounds = array<i64: 128, 128>}, {transform_indices = @transform_1, window_bounds = array<i64: 128, 128>}, {transform_indices = @transform_2, window_bounds = array<i64: 128, 128>}]} {
    %c0 = arith.constant 0 : index
    %c0_0 = arith.constant 0 : index
    %0 = vector.load %arg2[%c0, %c0_0] : memref<128x128xf32, #tpu.memory_space<vmem>>, vector<128x128xf32>
    %c0_1 = arith.constant 0 : index
    %c0_2 = arith.constant 0 : index
    %1 = vector.load %arg3[%c0_1, %c0_2] : memref<128x128xf32, #tpu.memory_space<vmem>>, vector<128x128xf32>
    %cst = arith.constant dense<0.000000e+00> : vector<128x128xf32>
    %2 = tpu.matmul %0, %1, %cst {dimension_numbers = #tpu.dot_dimension_numbers<[1], [0], [0], [1], [0, 0, 1, 1], [], []>} : vector<128x128xf32>, vector<128x128xf32>, vector<128x128xf32> -> vector<128x128xf32>
    %c0_i32 = arith.constant 0 : i32
    %3 = arith.cmpi eq, %arg1, %c0_i32 : i32
    %4 = arith.extui %3 : i1 to i32
    %c0_i32_3 = arith.constant 0 : i32
    %5 = arith.cmpi ne, %4, %c0_i32_3 : i32
    scf.if %5 {
      %c0_8 = arith.constant 0 : index
      %c0_9 = arith.constant 0 : index
      %12 = vector.load %arg5[%c0_8, %c0_9] : memref<128x128xf32, #tpu.memory_space<vmem>>, vector<128x128xf32>
      tpu.vector_store %arg5[%c0_8, %c0_9], %2 {strides = array<i32>} : memref<128x128xf32, #tpu.memory_space<vmem>>, vector<128x128xf32>,
    } else {
    }
    %c0_i32_4 = arith.constant 0 : i32
    %6 = arith.cmpi ne, %arg1, %c0_i32_4 : i32
    %7 = arith.extui %6 : i1 to i32
    %c0_i32_5 = arith.constant 0 : i32
    %8 = arith.cmpi ne, %7, %c0_i32_5 : i32
    scf.if %8 {
      %c0_8 = arith.constant 0 : index
      %c0_9 = arith.constant 0 : index
      %12 = vector.load %arg5[%c0_8, %c0_9] : memref<128x128xf32, #tpu.memory_space<vmem>>, vector<128x128xf32>
      %13 = arith.addf %12, %2 : vector<128x128xf32>
      %c0_10 = arith.constant 0 : index
      %c0_11 = arith.constant 0 : index
      %14 = vector.load %arg5[%c0_10, %c0_11] : memref<128x128xf32, #tpu.memory_space<vmem>>, vector<128x128xf32>
      tpu.vector_store %arg5[%c0_10, %c0_11], %13 {strides = array<i32>} : memref<128x128xf32, #tpu.memory_space<vmem>>, vector<128x128xf32>,
    } else {
    }
    %c0_i32_6 = arith.constant 0 : i32
    %9 = arith.cmpi eq, %arg1, %c0_i32_6 : i32
    %10 = arith.extui %9 : i1 to i32
    %c0_i32_7 = arith.constant 0 : i32
    %11 = arith.cmpi ne, %10, %c0_i32_7 : i32
    scf.if %11 {
      %c0_8 = arith.constant 0 : index
      %c0_9 = arith.constant 0 : index
      %12 = vector.load %arg5[%c0_8, %c0_9] : memref<128x128xf32, #tpu.memory_space<vmem>>, vector<128x128xf32>
      %c0_10 = arith.constant 0 : index
      %c0_11 = arith.constant 0 : index
      %13 = vector.load %arg4[%c0_10, %c0_11] : memref<128x128xf32, #tpu.memory_space<vmem>>, vector<128x128xf32>
      tpu.vector_store %arg4[%c0_10, %c0_11], %12 {strides = array<i32>} : memref<128x128xf32, #tpu.memory_space<vmem>>, vector<128x128xf32>,
    } else {
    }
    return
  }
  func.func @transform_0(%arg0: i32, %arg1: i32) -> (i32, i32) {
    %c0_i32 = arith.constant 0 : i32
    return %arg0, %arg1 : i32, i32
  }
  func.func @transform_1(%arg0: i32, %arg1: i32) -> (i32, i32) {
    %c0_i32 = arith.constant 0 : i32
    %c0_i32_0 = arith.constant 0 : i32
    return %arg1, %c0_i32 : i32, i32
  }
  func.func @transform_2(%arg0: i32, %arg1: i32) -> (i32, i32) {
    %c0_i32 = arith.constant 0 : i32
    %c0_i32_0 = arith.constant 0 : i32
    return %arg0, %c0_i32 : i32, i32
  }
}

module attributes {stable_mosaic.version = 11 : i64} {
  func.func @_mm_kernel(%arg0: i32, %arg1: i32, %arg2: memref<128x128xf32, #tpu.memory_space<vmem>>, %arg3: memref<128x128xf32, #tpu.memory_space<vmem>>, %arg4: memref<128x128xf32, #tpu.memory_space<vmem>>, %arg5: memref<128x128xf32, #tpu.memory_space<vmem>>) attributes {dimension_semantics = [#tpu.dimension_semantics<parallel>, #tpu.dimension_semantics<arbitrary>], iteration_bounds = array<i64: 2, 2>, scalar_prefetch = 0 : i64, scratch_operands = 1 : i64, tpu.core_type = #tpu.core_type<tc>, window_params = [{transform_indices = @transform_0, window_bounds = array<i64: 128, 128>}, {transform_indices = @transform_1, window_bounds = array<i64: 128, 128>}, {transform_indices = @transform_2, window_bounds = array<i64: 128, 128>}]} {
    %c0 = arith.constant 0 : index
    %c0_0 = arith.constant 0 : index
    %0 = vector.load %arg2[%c0, %c0_0] : memref<128x128xf32, #tpu.memory_space<vmem>>, vector<128x128xf32>
    %c0_1 = arith.constant 0 : index
    %c0_2 = arith.constant 0 : index
    %1 = vector.load %arg3[%c0_1, %c0_2] : memref<128x128xf32, #tpu.memory_space<vmem>>, vector<128x128xf32>
    %cst = arith.constant dense<0.000000e+00> : vector<128x128xf32>
    %2 = tpu.matmul %0, %1, %cst {dimension_numbers = #tpu.dot_dimension_numbers<[1], [0], [0], [1], [0, 0, 1, 1], [], []>} : vector<128x128xf32>, vector<128x128xf32>, vector<128x128xf32> -> vector<128x128xf32>
    %c0_i32 = arith.constant 0 : i32
    %3 = arith.cmpi eq, %arg1, %c0_i32 : i32
    %4 = arith.extui %3 : i1 to i32
    %c0_i32_3 = arith.constant 0 : i32
    %5 = arith.cmpi ne, %4, %c0_i32_3 : i32
    scf.if %5 {
      %c0_7 = arith.constant 0 : index
      %c0_8 = arith.constant 0 : index
      %12 = vector.load %arg5[%c0_7, %c0_8] : memref<128x128xf32, #tpu.memory_space<vmem>>, vector<128x128xf32>
      tpu.vector_store %arg5[%c0_7, %c0_8], %2 {strides = array<i32>} : memref<128x128xf32, #tpu.memory_space<vmem>>, vector<128x128xf32>,
    } else {
    }
    %c0_i32_4 = arith.constant 0 : i32
    %6 = arith.cmpi ne, %arg1, %c0_i32_4 : i32
    %7 = arith.extui %6 : i1 to i32
    %c0_i32_5 = arith.constant 0 : i32
    %8 = arith.cmpi ne, %7, %c0_i32_5 : i32
    scf.if %8 {
      %c0_7 = arith.constant 0 : index
      %c0_8 = arith.constant 0 : index
      %12 = vector.load %arg5[%c0_7, %c0_8] : memref<128x128xf32, #tpu.memory_space<vmem>>, vector<128x128xf32>
      %13 = arith.addf %12, %2 : vector<128x128xf32>
      %c0_9 = arith.constant 0 : index
      %c0_10 = arith.constant 0 : index
      %14 = vector.load %arg5[%c0_9, %c0_10] : memref<128x128xf32, #tpu.memory_space<vmem>>, vector<128x128xf32>
      tpu.vector_store %arg5[%c0_9, %c0_10], %13 {strides = array<i32>} : memref<128x128xf32, #tpu.memory_space<vmem>>, vector<128x128xf32>,
    } else {
    }
    %c1_i32 = arith.constant 1 : i32
    %9 = arith.cmpi eq, %arg1, %c1_i32 : i32
    %10 = arith.extui %9 : i1 to i32
    %c0_i32_6 = arith.constant 0 : i32
    %11 = arith.cmpi ne, %10, %c0_i32_6 : i32
    scf.if %11 {
      %c0_7 = arith.constant 0 : index
      %c0_8 = arith.constant 0 : index
      %12 = vector.load %arg5[%c0_7, %c0_8] : memref<128x128xf32, #tpu.memory_space<vmem>>, vector<128x128xf32>
      %c0_9 = arith.constant 0 : index
      %c0_10 = arith.constant 0 : index
      %13 = vector.load %arg4[%c0_9, %c0_10] : memref<128x128xf32, #tpu.memory_space<vmem>>, vector<128x128xf32>
      tpu.vector_store %arg4[%c0_9, %c0_10], %12 {strides = array<i32>} : memref<128x128xf32, #tpu.memory_space<vmem>>, vector<128x128xf32>,
    } else {
    }
    return
  }
  func.func @transform_0(%arg0: i32, %arg1: i32) -> (i32, i32) {
    %c0_i32 = arith.constant 0 : i32
    return %arg0, %arg1 : i32, i32
  }
  func.func @transform_1(%arg0: i32, %arg1: i32) -> (i32, i32) {
    %c0_i32 = arith.constant 0 : i32
    %c0_i32_0 = arith.constant 0 : i32
    return %arg1, %c0_i32 : i32, i32
  }
  func.func @transform_2(%arg0: i32, %arg1: i32) -> (i32, i32) {
    %c0_i32 = arith.constant 0 : i32
    %c0_i32_0 = arith.constant 0 : i32
    return %arg0, %c0_i32 : i32, i32
  }
}

</mosaic_0001>

<bundles_post_ra>
// kernel: graph_convolution.2
= control target key start
LH: loop header
LB: loop body
LE: loop exit
PB: predicated region body
PF: predicated region fallthrough
CT: control target
= control target key end

     0   :  { %s770_s9 = smov 0   ;;  %s772_s10 = smov 0   ;;  %s894_s0 = inlined_call_operand.vmem [shape: f32[256,128], index: 0, kind: input, shape index: {}]   ;;  %s895_s1 = inlined_call_operand.vmem [shape: f32[128,128], index: 1, kind: input, shape index: {}]   ;;  %s896_s2 = inlined_call_operand.vmem [shape: f32[256,128], index: 2, kind: output, shape index: {}]  }
   0x1   :  { %s774_s11 = smov 0  }
   0x2 LB: > { %s24_s12 = sadd.s32 1, %s749_s10  ;;  %p564_p0 = scmp.ge.s32.totalorder %s753_s11, 1  ;;  %s753_s11 = sphi %s774_s11, %s12_s11   ;;  %s749_s10 = sphi %s772_s10, %s898_s10   ;;  %s745_s9 = sphi %s770_s9, %s897_s9  }
   0x3   : > { %p26_p1 = scmp.ge.s32.totalorder %s24_s12, 2  ;;  %p141_p2 = scmp.lt.s32.totalorder %s753_s11, 3 }
   0x5   : > { %s900_s12 = smov (%p26_p1, %s24_s12), 0  ;;  %p142_p3 = pnand %p564_p0, %p141_p2 }
   0x6   : > { %v208_v0 = vld [vmem:[%s895_s1] sm:$0xff] (!%p142_p3)  ;;  %v209_v1 = vld [vmem:[%s895_s1 + $0x8] sm:$0xff] (!%p142_p3)  ;;  %v210_v2 = vld [vmem:[%s895_s1 + $0x10] sm:$0xff] (!%p142_p3)  ;;  %s565_s19 = sshll.u32 (!%p142_p3), %s745_s9, 4 }
   0x7   : > { %145 = sbr.rel (%p142_p3) target bundleno = 268 (0x10c), region = 28  ;;  %v659_v3 = vpack.c.bf16 (!%p142_p3), %v209_v1, %v208_v0  ;;  %v211_v4 = vld [vmem:[%s895_s1 + $0x18] sm:$0xff] (!%p142_p3)  ;;  %p172_p4 = scmp.lt.s32.totalorder (!%p142_p3), %s565_s19, 31  ;;  %v212_v6 = vld [vmem:[%s895_s1 + $0x20] sm:$0xff] (!%p142_p3)  ;;  %v213_v7 = vld [vmem:[%s895_s1 + $0x28] sm:$0xff] (!%p142_p3) }
   0x8   : > { %v663_v5 = vpack.c.bf16 (!%p142_p3), %v211_v4, %v210_v2  ;;  %v667_v8 = vpack.c.bf16 (!%p142_p3), %v213_v7, %v212_v6  ;;  %v214_v9 = vld [vmem:[%s895_s1 + $0x30] sm:$0xff] (!%p142_p3)  ;;  %v215_v10 = vld [vmem:[%s895_s1 + $0x38] sm:$0xff] (!%p142_p3)  ;;  %v216_v14 = vld [vmem:[%s895_s1 + $0x40] sm:$0xff] (!%p142_p3) }
   0x9   : > { %660 = vmatprep.subr.bf16.mxu0 (!%p142_p3), %v659_v3  ;;  %691 = vmatprep.subr.bf16.mxu1 (!%p142_p3), %v659_v3  ;;  %v671_v13 = vpack.c.bf16 (!%p142_p3), %v215_v10, %v214_v9  ;;  %v217_v15 = vld [vmem:[%s895_s1 + $0x48] sm:$0xff] (!%p142_p3)  ;;  %v218_v17 = vld [vmem:[%s895_s1 + $0x50] sm:$0xff] (!%p142_p3)  ;;  %v219_v18 = vld [vmem:[%s895_s1 + $0x58] sm:$0xff] (!%p142_p3) }
   0xa   : > { %662 = vmatpush3.bf16.msra.mxu0 (!%p142_p3), %v659_v3  ;;  %699 = vmatpush3.bf16.msra.mxu1 (!%p142_p3), %v659_v3  ;;  %v675_v16 = vpack.c.bf16 (!%p142_p3), %v217_v15, %v216_v14  ;;  %v679_v19 = vpack.c.bf16 (!%p142_p3), %v219_v18, %v218_v17  ;;  %v220_v20 = vld [vmem:[%s895_s1 + $0x60] sm:$0xff] (!%p142_p3)  ;;  %v221_v21 = vld [vmem:[%s895_s1 + $0x68] sm:$0xff] (!%p142_p3)  ;;  %v222_v23 = vld [vmem:[%s895_s1 + $0x70] sm:$0xff] (!%p142_p3) }
   0xb   : > { %664 = vmatprep.subr.bf16.mxu0 (!%p142_p3), %v663_v5  ;;  %692 = vmatprep.subr.bf16.mxu1 (!%p142_p3), %v663_v5  ;;  %v683_v22 = vpack.c.bf16 (!%p142_p3), %v221_v21, %v220_v20  ;;  %v223_v24 = vld [vmem:[%s895_s1 + $0x78] sm:$0xff] (!%p142_p3) }
   0xc   : > { %v687_v25 = vpack.c.bf16 (!%p142_p3), %v223_v24, %v222_v23 }
   0xe   : > { %s902_s19 = smov (!%p172_p4, %s565_s19), 31  ;;  %666 = vmatpush3.bf16.msra.mxu0 %v663_v5  ;;  %700 = vmatpush3.bf16.msra.mxu1 %v663_v5 }
   0xf   : > { %s566_s26 = sshll.u32 %s902_s19, 3  ;;  %668 = vmatprep.subr.bf16.mxu0 %v667_v8  ;;  %693 = vmatprep.subr.bf16.mxu1 %v667_v8 }
  0x10   : > { %s820_s5 = scalar_lea.vmem %s894_s0, %s566_s26  ;;  %s867_s29 = scalar_lea.vmem %s896_s2, %s566_s26 }
  0x11   : > { %v192_v11 = vld [vmem:[%s820_s5] sm:$0xff]  ;;  %v193_v26 = vld [vmem:[%s820_s5 + $0x8] sm:$0xff]  ;;  %v194_v28 = vld [vmem:[%s820_s5 + $0x10] sm:$0xff] }
  0x12   : > { %v200_v12 = vld [vmem:[%s820_s5 + $0x40] sm:$0xff]  ;;  %635 = vmatprep.mubr.f32.mxu0 %v192_v11  ;;  %670 = vmatpush3.bf16.msra.mxu0 %v667_v8  ;;  %v201_v27 = vld [vmem:[%s820_s5 + $0x48] sm:$0xff]  ;;  %v202_v29 = vld [vmem:[%s820_s5 + $0x50] sm:$0xff] }
  0x13   : > { %647 = vmatprep.mubr.f32.mxu1 %v200_v12  ;;  %701 = vmatpush3.bf16.msra.mxu1 %v667_v8  ;;  %v195_v30 = vld [vmem:[%s820_s5 + $0x18] sm:$0xff]  ;;  %v196_v32 = vld [vmem:[%s820_s5 + $0x20] sm:$0xff]  ;;  %v197_v34 = vld [vmem:[%s820_s5 + $0x28] sm:$0xff] }
  0x14   : > { %672 = vmatprep.subr.bf16.mxu0 %v671_v13  ;;  %694 = vmatprep.subr.bf16.mxu1 %v671_v13  ;;  %v203_v31 = vld [vmem:[%s820_s5 + $0x58] sm:$0xff]  ;;  %v204_v33 = vld [vmem:[%s820_s5 + $0x60] sm:$0xff]  ;;  %v205_v35 = vld [vmem:[%s820_s5 + $0x68] sm:$0xff] }
  0x15   : > { %v198_v36 = vld [vmem:[%s820_s5 + $0x30] sm:$0xff]  ;;  %v199_v38 = vld [vmem:[%s820_s5 + $0x38] sm:$0xff] }
  0x16   : > { %674 = vmatpush3.bf16.msra.mxu0 %v671_v13  ;;  %v206_v37 = vld [vmem:[%s820_s5 + $0x70] sm:$0xff]  ;;  %v207_v39 = vld [vmem:[%s820_s5 + $0x78] sm:$0xff] }
  0x17   : > { %702 = vmatpush3.bf16.msra.mxu1 %v671_v13  ;;  %676 = vmatprep.subr.bf16.mxu0 %v675_v16 }
  0x18   : > { %695 = vmatprep.subr.bf16.mxu1 %v675_v16 }
  0x1a   : > { %678 = vmatpush3.bf16.msra.mxu0 %v675_v16 }
  0x1b   : > { %703 = vmatpush3.bf16.msra.mxu1 %v675_v16  ;;  %680 = vmatprep.subr.bf16.mxu0 %v679_v19 }
  0x1c   : > { %696 = vmatprep.subr.bf16.mxu1 %v679_v19 }
  0x1e   : > { %682 = vmatpush3.bf16.msra.mxu0 %v679_v19 }
  0x1f   : > { %704 = vmatpush3.bf16.msra.mxu1 %v679_v19  ;;  %684 = vmatprep.subr.bf16.mxu0 %v683_v22 }
  0x20   : > { %697 = vmatprep.subr.bf16.mxu1 %v683_v22 }
  0x22   : > { %686 = vmatpush3.bf16.msra.mxu0 %v683_v22 }
  0x23   : > { %705 = vmatpush3.bf16.msra.mxu1 %v683_v22  ;;  %688 = vmatprep.subr.bf16.mxu0 %v687_v25 }
  0x24   : > { %698 = vmatprep.subr.bf16.mxu1 %v687_v25 }
  0x26   : > { %690 = vmatpush3.bf16.msra.mxu0 %v687_v25 }
  0x27   : > { %706 = vmatpush3.bf16.msra.mxu1 %v687_v25 }
  0x29   : > { %636 = vmatmul.mubr.f32.vlgmr.msra.gmra.mrb[0].mxu0 %v193_v26 }
  0x2a   : > { %648 = vmatmul.mubr.f32.vlgmr.msra.gmra.mrb[0].mxu1 %v201_v27  ;;  %638 = vmatprep.mubr.f32.mxu0 %v194_v28 }
  0x2b   : > { %650 = vmatprep.mubr.f32.mxu1 %v202_v29 }
  0x2d   : > { %639 = vmatmul.mubr.f32.gmra.mrb[2].mxu0 %v195_v30 }
  0x2e   : > { %651 = vmatmul.mubr.f32.gmra.mrb[2].mxu1 %v203_v31  ;;  %641 = vmatprep.mubr.f32.mxu0 %v196_v32 }
  0x2f   : > { %653 = vmatprep.mubr.f32.mxu1 %v204_v33 }
  0x31   : > { %642 = vmatmul.mubr.f32.gmra.mrb[4].mxu0 %v197_v34 }
  0x32   : > { %654 = vmatmul.mubr.f32.gmra.mrb[4].mxu1 %v205_v35  ;;  %644 = vmatprep.mubr.f32.mxu0 %v198_v36 }
  0x33   : > { %656 = vmatprep.mubr.f32.mxu1 %v206_v37 }
  0x35   : > { %645 = vmatmul.mubr.f32.gmra.mrb[6].mxu0 %v199_v38 }
  0x36   : > { %657 = vmatmul.mubr.f32.gmra.mrb[6].mxu1 %v207_v39 }
  0xfc   : > { %v637_v40 = vpop.f32.mrb[0].mxu0 }
  0xfd   : > { %v649_v41 = vpop.f32.mrb[0].mxu1  ;;  %461 = vst [vmem:[%s867_s29 + $0x8] sm:$0xff] %v637_v40  ;;  %v290_v42 = vpop.f32.mrb[1].mxu0 }
  0xfe   : > { %469 = vst [vmem:[%s867_s29 + $0x48] sm:$0xff] %v649_v41  ;;  %v330_v43 = vpop.f32.mrb[1].mxu1  ;;  %460 = vst [vmem:[%s867_s29] sm:$0xff] %v290_v42 }
  0xff   : > { %468 = vst [vmem:[%s867_s29 + $0x40] sm:$0xff] %v330_v43 }
 0x100   : > { %v640_v44 = vpop.f32.mrb[2].mxu0 }
 0x101   : > { %v652_v45 = vpop.f32.mrb[2].mxu1  ;;  %463 = vst [vmem:[%s867_s29 + $0x18] sm:$0xff] %v640_v44  ;;  %v300_v46 = vpop.f32.mrb[3].mxu0 }
 0x102   : > { %471 = vst [vmem:[%s867_s29 + $0x58] sm:$0xff] %v652_v45  ;;  %v340_v47 = vpop.f32.mrb[3].mxu1  ;;  %462 = vst [vmem:[%s867_s29 + $0x10] sm:$0xff] %v300_v46 }
 0x103   : > { %470 = vst [vmem:[%s867_s29 + $0x50] sm:$0xff] %v340_v47 }
 0x104   : > { %v643_v48 = vpop.f32.mrb[4].mxu0 }
 0x105   : > { %v655_v49 = vpop.f32.mrb[4].mxu1  ;;  %465 = vst [vmem:[%s867_s29 + $0x28] sm:$0xff] %v643_v48  ;;  %v310_v50 = vpop.f32.mrb[5].mxu0 }
 0x106   : > { %473 = vst [vmem:[%s867_s29 + $0x68] sm:$0xff] %v655_v49  ;;  %v350_v51 = vpop.f32.mrb[5].mxu1  ;;  %464 = vst [vmem:[%s867_s29 + $0x20] sm:$0xff] %v310_v50 }
 0x107   : > { %472 = vst [vmem:[%s867_s29 + $0x60] sm:$0xff] %v350_v51 }
 0x108   : > { %v646_v52 = vpop.f32.mrb[6].mxu0 }
 0x109   : > { %v658_v53 = vpop.f32.mrb[6].mxu1  ;;  %467 = vst [vmem:[%s867_s29 + $0x38] sm:$0xff] %v646_v52  ;;  %v320_v54 = vpop.f32.mrb[7].mxu0 }
 0x10a   : > { %475 = vst [vmem:[%s867_s29 + $0x78] sm:$0xff] %v658_v53  ;;  %v360_v55 = vpop.f32.mrb[7].mxu1  ;;  %466 = vst [vmem:[%s867_s29 + $0x30] sm:$0xff] %v320_v54 }
 0x10b   : > { %474 = vst [vmem:[%s867_s29 + $0x70] sm:$0xff] %v360_v55 }
 0x10c PF: > { %s12_s11 = sadd.s32 1, %s753_s11   ;;  %s897_s9 = smov %s749_s10 }
 0x10d   : > { %p9_p5 = scmp.ge.s32.totalorder %s12_s11, 4   ;;  %s898_s10 = smov %s900_s12 }
 0x10f   :  { %11 = sbr.rel (!%p9_p5) target bundleno = 2 (0x2), region = 73 }

// kernel: graph_convolution.3
= control target key start
LH: loop header
LB: loop body
LE: loop exit
PB: predicated region body
PF: predicated region fallthrough
CT: control target
= control target key end

     0   :  { %s935_s9 = smov 0   ;;  %s937_s10 = smov 0   ;;  %s1114_s0 = inlined_call_operand.vmem [shape: f32[256,256], index: 0, kind: input, shape index: {}]   ;;  %s1115_s1 = inlined_call_operand.vmem [shape: f32[256,128], index: 1, kind: input, shape index: {}]   ;;  %s1116_s2 = inlined_call_operand.vmem [shape: f32[256,128], index: 2, kind: output, shape index: {}]  }
   0x1   :  { %s939_s11 = smov 0   ;;  %s941_s12 = smov 0  }
   0x2   :  { %s943_s13 = smov 0   ;;  %s945_s14 = smov 0  }
   0x3   :  { %s947_s15 = smov 0  }
   0x4 LB: > { %s21_s16 = sadd.s32 1, %s910_s13  ;;  %s24_s17 = sadd.s32 1, %s914_s14  ;;  %s918_s15 = sphi %s947_s15, %s12_s15   ;;  %s914_s14 = sphi %s945_s14, %s1122_s14   ;;  %s910_s13 = sphi %s943_s13, %s1121_s13   ;;  %s906_s12 = sphi %s941_s12, %s1120_s12   ;;  %s902_s11 = sphi %s939_s11, %s1119_s11   ;;  %s898_s10 = sphi %s937_s10, %s1118_s10   ;;  %s894_s9 = sphi %s935_s9, %s1117_s9  }
   0x5   : > { %p22_p0 = scmp.ge.s32.totalorder %s21_s16, 2  ;;  %p40_p1 = scmp.ne.s32.totalorder %s898_s10, %s894_s9 }
   0x6   : > { %p41_p2 = scmp.eq.s32.totalorder %s918_s15, 0  ;;  %s33_s21 = sadd.s32 1, %s898_s10 }
   0x7   : > { %s1124_s16 = smov (%p22_p0, %s21_s16), 0  ;;  %s1126_s17 = smov (!%p22_p0, %s24_s17), %s914_s14 }
   0x8   : > { %p42_p3 = por %p41_p2, %p40_p1  ;;  %p26_p4 = scmp.ge.s32.totalorder %s1126_s17, 2 }
   0x9   : > { %s29_s18 = ssub.s32 %s910_s13, %s1124_s16  ;;  %p655_p6 = scmp.ge.s32.totalorder %s918_s15, 4 }
   0xa   : > { %s1128_s17 = smov (%p26_p4, %s1126_s17), 0 }
   0xb   : > { %s28_s19 = ssub.s32 %s914_s14, %s1128_s17  ;;  %118 = sbr.rel (%p655_p6) target bundleno = 32 (0x20), region = 16 }
   0xc   : > { %s30_s20 = sor.u32 %s29_s18, %s28_s19 }
   0xd   : > { %p31_p5 = scmp.eq.s32.totalorder %s30_s20, 0 }
   0xf   : > { %s986_s22 = scalar_select %p31_p5, %s898_s10, %s33_s21  }
  0x12   : > { %121 = sbr.rel (!%p42_p3) target bundleno = 32 (0x20), region = 20  ;;  %s123_s23 = sand.u32 (%p42_p3), 1, %s898_s10  }
  0x13   : > { %s671_s24 = sshll.u32 (%p42_p3), %s914_s14, 5  ;;  %s656_s25 = sshll.u32 (%p42_p3), %s123_s23, 7 }
  0x14   : > { %s128_s26 = sadd.s32 (%p42_p3), %s910_s13, %s671_s24  ;;  %s125_s3 = scalar_lea.vmem (%p42_p3), [#allocation3], %s656_s25 }
  0x15   : > { %s659_s27 = sshll.u32 (%p42_p3), %s128_s26, 3 }
  0x16   : > { %s995_s30 = scalar_lea.vmem (%p42_p3), %s1114_s0, %s659_s27 }
  0x17   : > { %v188_v0 = vld [vmem:[%s995_s30] sm:$0xff] (%p42_p3)  ;;  %v190_v1 = vld [vmem:[%s995_s30 + $0x10] sm:$0xff] (%p42_p3) }
  0x18   : > { %v192_v2 = vld [vmem:[%s995_s30 + $0x20] sm:$0xff] (%p42_p3)  ;;  %189 = vst [vmem:[%s125_s3] sm:$0xff] (%p42_p3), %v188_v0  ;;  %191 = vst [vmem:[%s125_s3 + $0x8] sm:$0xff] (%p42_p3), %v190_v1  ;;  %v194_v3 = vld [vmem:[%s995_s30 + $0x30] sm:$0xff] (%p42_p3) }
  0x19   : > { %193 = vst [vmem:[%s125_s3 + $0x10] sm:$0xff] %v192_v2  ;;  %v196_v4 = vld [vmem:[%s995_s30 + $0x40] sm:$0xff]  ;;  %v198_v5 = vld [vmem:[%s995_s30 + $0x50] sm:$0xff]  ;;  %195 = vst [vmem:[%s125_s3 + $0x18] sm:$0xff] %v194_v3 }
  0x1a   : > { %197 = vst [vmem:[%s125_s3 + $0x20] sm:$0xff] %v196_v4  ;;  %199 = vst [vmem:[%s125_s3 + $0x28] sm:$0xff] %v198_v5  ;;  %v200_v6 = vld [vmem:[%s995_s30 + $0x60] sm:$0xff]  ;;  %v202_v7 = vld [vmem:[%s995_s30 + $0x70] sm:$0xff] }
  0x1b   : > { %v204_v8 = vld [vmem:[%s995_s30 + $0x80] sm:$0xff]  ;;  %201 = vst [vmem:[%s125_s3 + $0x30] sm:$0xff] %v200_v6  ;;  %203 = vst [vmem:[%s125_s3 + $0x38] sm:$0xff] %v202_v7  ;;  %v206_v9 = vld [vmem:[%s995_s30 + $0x90] sm:$0xff] }
  0x1c   : > { %205 = vst [vmem:[%s125_s3 + $0x40] sm:$0xff] %v204_v8  ;;  %v208_v10 = vld [vmem:[%s995_s30 + $0xa0] sm:$0xff]  ;;  %v210_v11 = vld [vmem:[%s995_s30 + $0xb0] sm:$0xff]  ;;  %207 = vst [vmem:[%s125_s3 + $0x48] sm:$0xff] %v206_v9 }
  0x1d   : > { %209 = vst [vmem:[%s125_s3 + $0x50] sm:$0xff] %v208_v10  ;;  %211 = vst [vmem:[%s125_s3 + $0x58] sm:$0xff] %v210_v11  ;;  %v212_v12 = vld [vmem:[%s995_s30 + $0xc0] sm:$0xff]  ;;  %v214_v13 = vld [vmem:[%s995_s30 + $0xd0] sm:$0xff] }
  0x1e   : > { %v216_v14 = vld [vmem:[%s995_s30 + $0xe0] sm:$0xff]  ;;  %213 = vst [vmem:[%s125_s3 + $0x60] sm:$0xff] %v212_v12  ;;  %215 = vst [vmem:[%s125_s3 + $0x68] sm:$0xff] %v214_v13  ;;  %v218_v15 = vld [vmem:[%s995_s30 + $0xf0] sm:$0xff] }
  0x1f   : > { %217 = vst [vmem:[%s125_s3 + $0x70] sm:$0xff] %v216_v14  ;;  %219 = vst [vmem:[%s125_s3 + $0x78] sm:$0xff] %v218_v15 }
  0x20 PF: > { %p660_p7 = scmp.ge.s32.totalorder %s918_s15, 1  ;;  %p233_p8 = scmp.lt.s32.totalorder %s918_s15, 5 }
  0x22   : > { %p234_p9 = pnand %p660_p7, %p233_p8 }
  0x23   : > { %s662_s4 = sshll.u32 (!%p234_p9), %s902_s11, 4  ;;  %s664_s5 = sshll.u32 (!%p234_p9), %s906_s12, 4 }
  0x24   : > { %237 = sbr.rel (%p234_p9) target bundleno = 330 (0x14a), region = 62  ;;  %p268_p10 = scmp.lt.s32.totalorder (!%p234_p9), %s662_s4, 31 }
  0x25   : > { %p274_p11 = scmp.lt.s32.totalorder (!%p234_p9), %s664_s5, 31  ;;  %s240_s6 = sand.u32 (!%p234_p9), 1, %s894_s9  }
  0x26   : > { %s661_s8 = sshll.u32 (!%p234_p9), %s240_s6, 7  ;;  %p666_p12 = scmp.ne.s32.totalorder (!%p234_p9), %s902_s11, 0 }
  0x27   : > { %s1034_s24 = scalar_lea.vmem (!%p234_p9), [#allocation3], %s661_s8 }
  0x28   : > { %v279_v25 = vld [vmem:[%s1034_s24] sm:$0xff] (!%p234_p9)  ;;  %v280_v42 = vld [vmem:[%s1034_s24 + $0x8] sm:$0xff] (!%p234_p9)  ;;  %v281_v44 = vld [vmem:[%s1034_s24 + $0x10] sm:$0xff] (!%p234_p9) }
  0x29   : > { %v287_v26 = vld [vmem:[%s1034_s24 + $0x40] sm:$0xff] (!%p234_p9)  ;;  %736 = vmatprep.mubr.f32.mxu0 (!%p234_p9), %v279_v25  ;;  %v288_v43 = vld [vmem:[%s1034_s24 + $0x48] sm:$0xff] (!%p234_p9)  ;;  %v289_v45 = vld [vmem:[%s1034_s24 + $0x50] sm:$0xff] (!%p234_p9) }
  0x2a   : > { %748 = vmatprep.mubr.f32.mxu1 (!%p234_p9), %v287_v26  ;;  %v282_v46 = vld [vmem:[%s1034_s24 + $0x18] sm:$0xff] (!%p234_p9)  ;;  %v283_v48 = vld [vmem:[%s1034_s24 + $0x20] sm:$0xff] (!%p234_p9)  ;;  %v284_v50 = vld [vmem:[%s1034_s24 + $0x28] sm:$0xff] (!%p234_p9) }
  0x2b   : > { %s1130_s4 = smov (!%p268_p10, %s662_s4), 31  ;;  %s1132_s5 = smov (!%p274_p11, %s664_s5), 31  ;;  %v290_v47 = vld [vmem:[%s1034_s24 + $0x58] sm:$0xff]  ;;  %v291_v49 = vld [vmem:[%s1034_s24 + $0x60] sm:$0xff]  ;;  %v292_v51 = vld [vmem:[%s1034_s24 + $0x68] sm:$0xff] }
  0x2c   : > { %s663_s7 = sshll.u32 %s1130_s4, 3  ;;  %s665_s21 = sshll.u32 %s1132_s5, 3  ;;  %v285_v52 = vld [vmem:[%s1034_s24 + $0x30] sm:$0xff]  ;;  %v286_v54 = vld [vmem:[%s1034_s24 + $0x38] sm:$0xff] }
  0x2d   : > { %s1021_s20 = scalar_lea.vmem %s1115_s1, %s663_s7  ;;  %s1026_s9 = scalar_lea.vmem %s1116_s2, %s665_s21  ;;  %v293_v53 = vld [vmem:[%s1034_s24 + $0x70] sm:$0xff]  ;;  %v294_v55 = vld [vmem:[%s1034_s24 + $0x78] sm:$0xff] }
  0x2e   : > { %v295_v16 = vld [vmem:[%s1021_s20] sm:$0xff]  ;;  %v296_v17 = vld [vmem:[%s1021_s20 + $0x8] sm:$0xff]  ;;  %v297_v18 = vld [vmem:[%s1021_s20 + $0x10] sm:$0xff] }
  0x2f   : > { %v760_v19 = vpack.c.bf16 %v296_v17, %v295_v16  ;;  %v298_v20 = vld [vmem:[%s1021_s20 + $0x18] sm:$0xff]  ;;  %v299_v22 = vld [vmem:[%s1021_s20 + $0x20] sm:$0xff]  ;;  %v300_v23 = vld [vmem:[%s1021_s20 + $0x28] sm:$0xff] }
  0x30   : > { %v764_v21 = vpack.c.bf16 %v298_v20, %v297_v18  ;;  %v768_v24 = vpack.c.bf16 %v300_v23, %v299_v22  ;;  %v301_v27 = vld [vmem:[%s1021_s20 + $0x30] sm:$0xff]  ;;  %v302_v28 = vld [vmem:[%s1021_s20 + $0x38] sm:$0xff]  ;;  %v303_v30 = vld [vmem:[%s1021_s20 + $0x40] sm:$0xff] }
  0x31   : > { %761 = vmatprep.subr.bf16.mxu0 %v760_v19  ;;  %792 = vmatprep.subr.bf16.mxu1 %v760_v19  ;;  %v772_v29 = vpack.c.bf16 %v302_v28, %v301_v27  ;;  %v304_v31 = vld [vmem:[%s1021_s20 + $0x48] sm:$0xff]  ;;  %v305_v33 = vld [vmem:[%s1021_s20 + $0x50] sm:$0xff]  ;;  %v306_v34 = vld [vmem:[%s1021_s20 + $0x58] sm:$0xff] }
  0x32   : > { %763 = vmatpush3.bf16.msra.mxu0 %v760_v19  ;;  %800 = vmatpush3.bf16.msra.mxu1 %v760_v19  ;;  %v776_v32 = vpack.c.bf16 %v304_v31, %v303_v30  ;;  %v780_v35 = vpack.c.bf16 %v306_v34, %v305_v33  ;;  %v307_v36 = vld [vmem:[%s1021_s20 + $0x60] sm:$0xff]  ;;  %v308_v37 = vld [vmem:[%s1021_s20 + $0x68] sm:$0xff]  ;;  %v309_v39 = vld [vmem:[%s1021_s20 + $0x70] sm:$0xff] }
  0x33   : > { %765 = vmatprep.subr.bf16.mxu0 %v764_v21  ;;  %793 = vmatprep.subr.bf16.mxu1 %v764_v21  ;;  %v784_v38 = vpack.c.bf16 %v308_v37, %v307_v36  ;;  %v310_v40 = vld [vmem:[%s1021_s20 + $0x78] sm:$0xff] }
  0x34   : > { %v788_v41 = vpack.c.bf16 %v310_v40, %v309_v39 }
  0x36   : > { %767 = vmatpush3.bf16.msra.mxu0 %v764_v21  ;;  %801 = vmatpush3.bf16.msra.mxu1 %v764_v21 }
  0x37   : > { %769 = vmatprep.subr.bf16.mxu0 %v768_v24  ;;  %794 = vmatprep.subr.bf16.mxu1 %v768_v24 }
  0x3a   : > { %771 = vmatpush3.bf16.msra.mxu0 %v768_v24  ;;  %802 = vmatpush3.bf16.msra.mxu1 %v768_v24 }
  0x3b   : > { %773 = vmatprep.subr.bf16.mxu0 %v772_v29  ;;  %795 = vmatprep.subr.bf16.mxu1 %v772_v29 }
  0x3e   : > { %775 = vmatpush3.bf16.msra.mxu0 %v772_v29  ;;  %803 = vmatpush3.bf16.msra.mxu1 %v772_v29 }
  0x3f   : > { %777 = vmatprep.subr.bf16.mxu0 %v776_v32  ;;  %796 = vmatprep.subr.bf16.mxu1 %v776_v32 }
  0x42   : > { %779 = vmatpush3.bf16.msra.mxu0 %v776_v32  ;;  %804 = vmatpush3.bf16.msra.mxu1 %v776_v32 }
  0x43   : > { %781 = vmatprep.subr.bf16.mxu0 %v780_v35  ;;  %797 = vmatprep.subr.bf16.mxu1 %v780_v35 }
  0x46   : > { %783 = vmatpush3.bf16.msra.mxu0 %v780_v35  ;;  %805 = vmatpush3.bf16.msra.mxu1 %v780_v35 }
  0x47   : > { %785 = vmatprep.subr.bf16.mxu0 %v784_v38  ;;  %798 = vmatprep.subr.bf16.mxu1 %v784_v38 }
  0x4a   : > { %787 = vmatpush3.bf16.msra.mxu0 %v784_v38  ;;  %806 = vmatpush3.bf16.msra.mxu1 %v784_v38 }
  0x4b   : > { %789 = vmatprep.subr.bf16.mxu0 %v788_v41  ;;  %799 = vmatprep.subr.bf16.mxu1 %v788_v41 }
  0x4e   : > { %791 = vmatpush3.bf16.msra.mxu0 %v788_v41  ;;  %807 = vmatpush3.bf16.msra.mxu1 %v788_v41 }
  0x51   : > { %737 = vmatmul.mubr.f32.vlgmr.msra.gmra.mrb[0].mxu0 %v280_v42  ;;  %749 = vmatmul.mubr.f32.vlgmr.msra.gmra.mrb[0].mxu1 %v288_v43 }
  0x52   : > { %739 = vmatprep.mubr.f32.mxu0 %v281_v44  ;;  %751 = vmatprep.mubr.f32.mxu1 %v289_v45 }
  0x55   : > { %740 = vmatmul.mubr.f32.gmra.mrb[2].mxu0 %v282_v46  ;;  %752 = vmatmul.mubr.f32.gmra.mrb[2].mxu1 %v290_v47 }
  0x56   : > { %742 = vmatprep.mubr.f32.mxu0 %v283_v48  ;;  %754 = vmatprep.mubr.f32.mxu1 %v291_v49 }
  0x59   : > { %743 = vmatmul.mubr.f32.gmra.mrb[4].mxu0 %v284_v50  ;;  %755 = vmatmul.mubr.f32.gmra.mrb[4].mxu1 %v292_v51 }
  0x5a   : > { %745 = vmatprep.mubr.f32.mxu0 %v285_v52  ;;  %757 = vmatprep.mubr.f32.mxu1 %v293_v53 }
  0x5d   : > { %746 = vmatmul.mubr.f32.gmra.mrb[6].mxu0 %v286_v54  ;;  %758 = vmatmul.mubr.f32.gmra.mrb[6].mxu1 %v294_v55 }
 0x124   : > { %v738_v56 = vpop.f32.mrb[0].mxu0  ;;  %v1062_v57 = vpop.f32.mrb[0].mxu1 }
 0x125   : > { %v377_v58 = vpop.f32.mrb[1].mxu0  ;;  %v417_v59 = vpop.f32.mrb[1].mxu1  ;;  %461 = vst [vmem:[#allocation2 + $0x8] sm:$0xff] (!%p666_p12), %v738_v56  ;;  %469 = vst [vmem:[#allocation2 + $0x48] sm:$0xff] (!%p666_p12), %v1062_v57 }
 0x126   : > { %460 = vst [vmem:[#allocation2] sm:$0xff] (!%p666_p12), %v377_v58  ;;  %468 = vst [vmem:[#allocation2 + $0x40] sm:$0xff] (!%p666_p12), %v417_v59 }
 0x128   : > { %v741_v60 = vpop.f32.mrb[2].mxu0  ;;  %v753_v61 = vpop.f32.mrb[2].mxu1 }
 0x129   : > { %v387_v62 = vpop.f32.mrb[3].mxu0  ;;  %v427_v63 = vpop.f32.mrb[3].mxu1  ;;  %463 = vst [vmem:[#allocation2 + $0x18] sm:$0xff] (!%p666_p12), %v741_v60  ;;  %471 = vst [vmem:[#allocation2 + $0x58] sm:$0xff] (!%p666_p12), %v753_v61 }
 0x12a   : > { %462 = vst [vmem:[#allocation2 + $0x10] sm:$0xff] (!%p666_p12), %v387_v62  ;;  %470 = vst [vmem:[#allocation2 + $0x50] sm:$0xff] (!%p666_p12), %v427_v63 }
 0x12b   : > { %459 = sbr.rel (%p666_p12) target bundleno = 307 (0x133), region = 70 }
 0x12c   : > { %v744_v0 = vpop.f32.mrb[4].mxu0  ;;  %v1064_v1 = vpop.f32.mrb[4].mxu1 }
 0x12d   : > { %v397_v2 = vpop.f32.mrb[5].mxu0  ;;  %v437_v3 = vpop.f32.mrb[5].mxu1  ;;  %465 = vst [vmem:[#allocation2 + $0x28] sm:$0xff] (!%p666_p12), %v744_v0  ;;  %473 = vst [vmem:[#allocation2 + $0x68] sm:$0xff] (!%p666_p12), %v1064_v1 }
 0x12e   : > { %464 = vst [vmem:[#allocation2 + $0x20] sm:$0xff] (!%p666_p12), %v397_v2  ;;  %472 = vst [vmem:[#allocation2 + $0x60] sm:$0xff] (!%p666_p12), %v437_v3 }
 0x130   : > { %v747_v4 = vpop.f32.mrb[6].mxu0  ;;  %v1066_v5 = vpop.f32.mrb[6].mxu1 }
 0x131   : > { %v407_v6 = vpop.f32.mrb[7].mxu0  ;;  %v447_v7 = vpop.f32.mrb[7].mxu1  ;;  %467 = vst [vmem:[#allocation2 + $0x38] sm:$0xff] (!%p666_p12), %v747_v4  ;;  %475 = vst [vmem:[#allocation2 + $0x78] sm:$0xff] (!%p666_p12), %v1066_v5 }
 0x132   : > { %466 = vst [vmem:[#allocation2 + $0x30] sm:$0xff] %v407_v6  ;;  %474 = vst [vmem:[#allocation2 + $0x70] sm:$0xff] %v447_v7 }
 0x133 PF: > { %p667_p13 = scmp.eq.s32.totalorder %s902_s11, 0 }
 0x134   : > { %v480_v8 = vld [vmem:[#allocation2] sm:$0xff] (!%p667_p13)  ;;  %v481_v9 = vld [vmem:[#allocation2 + $0x8] sm:$0xff] (!%p667_p13)  ;;  %v482_v10 = vld [vmem:[#allocation2 + $0x10] sm:$0xff] (!%p667_p13) }
 0x135   : > { %479 = sbr.rel (%p667_p13) target bundleno = 319 (0x13f), region = 74  ;;  %v496_v11 = vadd.f32 (!%p667_p13), %v480_v8, %v377_v58  ;;  %v497_v12 = vadd.f32 (!%p667_p13), %v738_v56, %v481_v9  ;;  %v498_v13 = vadd.f32 (!%p667_p13), %v482_v10, %v387_v62  ;;  %v483_v14 = vld [vmem:[#allocation2 + $0x18] sm:$0xff] (!%p667_p13)  ;;  %v485_v16 = vld [vmem:[#allocation2 + $0x28] sm:$0xff] (!%p667_p13)  ;;  %v488_v22 = vld [vmem:[#allocation2 + $0x40] sm:$0xff] (!%p667_p13) }
 0x136   : > { %v484_v15 = vld [vmem:[#allocation2 + $0x20] sm:$0xff] (!%p667_p13)  ;;  %v499_v17 = vadd.f32 (!%p667_p13), %v741_v60, %v483_v14  ;;  %v501_v19 = vadd.f32 (!%p667_p13), %v744_v0, %v485_v16  ;;  %v504_v25 = vadd.f32 (!%p667_p13), %v488_v22, %v417_v59  ;;  %v489_v26 = vld [vmem:[#allocation2 + $0x48] sm:$0xff] (!%p667_p13)  ;;  %v490_v27 = vld [vmem:[#allocation2 + $0x50] sm:$0xff] (!%p667_p13) }
 0x137   : > { %v500_v18 = vadd.f32 (!%p667_p13), %v484_v15, %v397_v2  ;;  %512 = vst [vmem:[#allocation2] sm:$0xff] (!%p667_p13), %v496_v11  ;;  %513 = vst [vmem:[#allocation2 + $0x8] sm:$0xff] (!%p667_p13), %v497_v12  ;;  %v491_v28 = vld [vmem:[#allocation2 + $0x58] sm:$0xff] (!%p667_p13)  ;;  %v505_v29 = vadd.f32 (!%p667_p13), %v1062_v57, %v489_v26  ;;  %v506_v30 = vadd.f32 (!%p667_p13), %v490_v27, %v427_v63  ;;  %v492_v32 = vld [vmem:[#allocation2 + $0x60] sm:$0xff] (!%p667_p13) }
 0x138   : > { %514 = vst [vmem:[#allocation2 + $0x10] sm:$0xff] (!%p667_p13), %v498_v13  ;;  %515 = vst [vmem:[#allocation2 + $0x18] sm:$0xff] (!%p667_p13), %v499_v17  ;;  %v507_v31 = vadd.f32 (!%p667_p13), %v753_v61, %v491_v28  ;;  %v493_v33 = vld [vmem:[#allocation2 + $0x68] sm:$0xff] (!%p667_p13)  ;;  %v508_v35 = vadd.f32 (!%p667_p13), %v492_v32, %v437_v3 }
 0x139   : > { %v486_v20 = vld [vmem:[#allocation2 + $0x30] sm:$0xff] (!%p667_p13)  ;;  %v487_v21 = vld [vmem:[#allocation2 + $0x38] sm:$0xff] (!%p667_p13)  ;;  %516 = vst [vmem:[#allocation2 + $0x20] sm:$0xff] (!%p667_p13), %v500_v18  ;;  %517 = vst [vmem:[#allocation2 + $0x28] sm:$0xff] (!%p667_p13), %v501_v19  ;;  %v509_v36 = vadd.f32 (!%p667_p13), %v1064_v1, %v493_v33 }
 0x13a   : > { %v502_v23 = vadd.f32 (!%p667_p13), %v486_v20, %v407_v6  ;;  %v503_v24 = vadd.f32 (!%p667_p13), %v747_v4, %v487_v21  ;;  %v494_v34 = vld [vmem:[#allocation2 + $0x70] sm:$0xff] (!%p667_p13)  ;;  %520 = vst [vmem:[#allocation2 + $0x40] sm:$0xff] (!%p667_p13), %v504_v25  ;;  %v495_v38 = vld [vmem:[#allocation2 + $0x78] sm:$0xff] (!%p667_p13)  ;;  %521 = vst [vmem:[#allocation2 + $0x48] sm:$0xff] (!%p667_p13), %v505_v29 }
 0x13b   : > { %v510_v37 = vadd.f32 (!%p667_p13), %v494_v34, %v447_v7  ;;  %522 = vst [vmem:[#allocation2 + $0x50] sm:$0xff] (!%p667_p13), %v506_v30  ;;  %523 = vst [vmem:[#allocation2 + $0x58] sm:$0xff] (!%p667_p13), %v507_v31  ;;  %v511_v39 = vadd.f32 (!%p667_p13), %v1066_v5, %v495_v38 }
 0x13c   : > { %518 = vst [vmem:[#allocation2 + $0x30] sm:$0xff] %v502_v23  ;;  %519 = vst [vmem:[#allocation2 + $0x38] sm:$0xff] %v503_v24 }
 0x13d   : > { %524 = vst [vmem:[#allocation2 + $0x60] sm:$0xff] %v508_v35  ;;  %525 = vst [vmem:[#allocation2 + $0x68] sm:$0xff] %v509_v36 }
 0x13e   : > { %526 = vst [vmem:[#allocation2 + $0x70] sm:$0xff] %v510_v37  ;;  %527 = vst [vmem:[#allocation2 + $0x78] sm:$0xff] %v511_v39 }
 0x13f PF: > { %p668_p0 = scmp.ne.s32.totalorder %s902_s11, 1 }
 0x141   : > { %531 = sbr.rel (%p668_p0) target bundleno = 330 (0x14a), region = 78  ;;  %v532_v40 = vld [vmem:[#allocation2] sm:$0xff] (!%p668_p0)  ;;  %v533_v41 = vld [vmem:[#allocation2 + $0x8] sm:$0xff] (!%p668_p0) }
 0x142   : > { %v534_v42 = vld [vmem:[#allocation2 + $0x10] sm:$0xff] (!%p668_p0)  ;;  %548 = vst [vmem:[%s1026_s9] sm:$0xff] (!%p668_p0), %v532_v40  ;;  %549 = vst [vmem:[%s1026_s9 + $0x8] sm:$0xff] (!%p668_p0), %v533_v41  ;;  %v535_v43 = vld [vmem:[#allocation2 + $0x18] sm:$0xff] (!%p668_p0) }
 0x143   : > { %550 = vst [vmem:[%s1026_s9 + $0x10] sm:$0xff] (!%p668_p0), %v534_v42  ;;  %v536_v44 = vld [vmem:[#allocation2 + $0x20] sm:$0xff] (!%p668_p0)  ;;  %v537_v45 = vld [vmem:[#allocation2 + $0x28] sm:$0xff] (!%p668_p0)  ;;  %551 = vst [vmem:[%s1026_s9 + $0x18] sm:$0xff] (!%p668_p0), %v535_v43 }
 0x144   : > { %552 = vst [vmem:[%s1026_s9 + $0x20] sm:$0xff] (!%p668_p0), %v536_v44  ;;  %553 = vst [vmem:[%s1026_s9 + $0x28] sm:$0xff] (!%p668_p0), %v537_v45  ;;  %v540_v48 = vld [vmem:[#allocation2 + $0x40] sm:$0xff] (!%p668_p0)  ;;  %v541_v49 = vld [vmem:[#allocation2 + $0x48] sm:$0xff] (!%p668_p0) }
 0x145   : > { %556 = vst [vmem:[%s1026_s9 + $0x40] sm:$0xff] (!%p668_p0), %v540_v48  ;;  %v542_v50 = vld [vmem:[#allocation2 + $0x50] sm:$0xff] (!%p668_p0)  ;;  %v543_v51 = vld [vmem:[#allocation2 + $0x58] sm:$0xff] (!%p668_p0)  ;;  %557 = vst [vmem:[%s1026_s9 + $0x48] sm:$0xff] (!%p668_p0), %v541_v49 }
 0x146   : > { %v538_v46 = vld [vmem:[#allocation2 + $0x30] sm:$0xff] (!%p668_p0)  ;;  %v539_v47 = vld [vmem:[#allocation2 + $0x38] sm:$0xff] (!%p668_p0)  ;;  %558 = vst [vmem:[%s1026_s9 + $0x50] sm:$0xff] (!%p668_p0), %v542_v50  ;;  %559 = vst [vmem:[%s1026_s9 + $0x58] sm:$0xff] (!%p668_p0), %v543_v51 }
 0x147   : > { %554 = vst [vmem:[%s1026_s9 + $0x30] sm:$0xff] (!%p668_p0), %v538_v46  ;;  %555 = vst [vmem:[%s1026_s9 + $0x38] sm:$0xff] (!%p668_p0), %v539_v47  ;;  %v544_v52 = vld [vmem:[#allocation2 + $0x60] sm:$0xff] (!%p668_p0)  ;;  %v545_v53 = vld [vmem:[#allocation2 + $0x68] sm:$0xff] (!%p668_p0) }
 0x148   : > { %v546_v54 = vld [vmem:[#allocation2 + $0x70] sm:$0xff]  ;;  %560 = vst [vmem:[%s1026_s9 + $0x60] sm:$0xff] %v544_v52  ;;  %561 = vst [vmem:[%s1026_s9 + $0x68] sm:$0xff] %v545_v53  ;;  %v547_v55 = vld [vmem:[#allocation2 + $0x78] sm:$0xff] }
 0x149   : > { %562 = vst [vmem:[%s1026_s9 + $0x70] sm:$0xff] %v546_v54  ;;  %563 = vst [vmem:[%s1026_s9 + $0x78] sm:$0xff] %v547_v55 }
 0x14a PF: > { %s12_s15 = sadd.s32 1, %s918_s15   ;;  %s1117_s9 = smov %s898_s10 }
 0x14b   : > { %p9_p1 = scmp.ge.s32.totalorder %s12_s15, 6   ;;  %s1118_s10 = smov %s986_s22 }
 0x14c   : > { %s1119_s11 = smov %s910_s13  ;;  %s1120_s12 = smov %s914_s14 }
 0x14d   : > { %s1121_s13 = smov %s1124_s16  ;;  %s1122_s14 = smov %s1128_s17 }
 0x14e   :  { %11 = sbr.rel (!%p9_p1) target bundleno = 4 (0x4), region = 116 }

</bundles_post_ra>
